<compile_context>
chip_gen: v7x
topology: tpu7x:2x2x1
jax: 0.10.0
libtpu: 0.0.40
codegen_flags: <defaults>
</compile_context>

<pallas_src>
import functools
import math

import jax
import jax.numpy as jnp
from jax import lax
from jax.experimental import pallas as pl
from jax.experimental.pallas import tpu as pltpu


def _round_up(v, m):
    return ((v + m - 1) // m) * m


@functools.lru_cache(maxsize=None)
def _vmem_limit_bytes():
    """Generation-aware VMEM limit: ~3/4 of physical VMEM, capped at 96 MiB.
    v5e/v6e (128 MiB physical) -> 96 MiB, v7x (64 MiB physical) -> 48 MiB."""
    cap = 64 * 1024 * 1024
    try:
        info = pltpu.get_tpu_info()
        cap = int(getattr(info, "vmem_capacity_bytes", cap))
    except Exception:
        pass
    return int(min(cap * 3 // 4, 96 * 1024 * 1024))


def _compiler_params():
    return pltpu.CompilerParams(
        dimension_semantics=("parallel",),
        vmem_limit_bytes=_vmem_limit_bytes(),
    )


def _pick_tile_rows(rows, fp32_cols_per_row, *, target=512,
                    budget_bytes=24 * 1024 * 1024):
    """Largest multiple-of-8 row tile whose double-buffered fp32 in-flight
    footprint (input + residual + output row tiles) fits the budget."""
    per_row = 2 * 4 * max(fp32_cols_per_row, 1)   # double-buffered, fp32
    cap = max(8, budget_bytes // per_row)
    tr = min(target, cap, _round_up(rows, 8))
    return max(8, (tr // 8) * 8)


# ---------------------------------------------------------------------------
# Exact (erf) GELU built from EUP/VPU-friendly ops so it can be fused in-kernel.
# ---------------------------------------------------------------------------
_SQRT_HALF = 0.7071067811865476


def _erf(x):
    # Abramowitz & Stegun 7.1.26 (|err| < 1.5e-7) -- only exp/mul/add/div/select.
    p = 0.3275911
    a1, a2, a3, a4, a5 = (0.254829592, -0.284496736, 1.421413741,
                          -1.453152027, 1.061405429)
    sign = jnp.where(x >= 0.0, 1.0, -1.0)
    ax = jnp.abs(x)
    t = 1.0 / (1.0 + p * ax)
    poly = ((((a5 * t + a4) * t + a3) * t + a2) * t + a1) * t
    return sign * (1.0 - poly * jnp.exp(-ax * ax))


def _gelu_exact(x):
    # Matches torch.nn.GELU() default (exact / erf formulation).
    return 0.5 * x * (1.0 + _erf(x * _SQRT_HALF))


# ---------------------------------------------------------------------------
# Linear kernel: y = act(x @ w + b).  bf16 MXU operands, fp32 accumulation,
# optional fused GELU epilogue.  Rows tiled; weights/bias stay VMEM-resident.
# TODO(synk): tile K/N with a scratch accumulator (or drop weights to single
# buffering) if d_model/d_ff ever make the resident weight block too large
# for v7x's 64 MiB VMEM.
# ---------------------------------------------------------------------------
def _linear_kernel(x_ref, w_ref, b_ref, o_ref, *, activation):
    x = x_ref[...].astype(jnp.bfloat16)                       # bf16 -> MXU
    w = w_ref[...]                                            # already bf16
    y = jnp.dot(x, w, preferred_element_type=jnp.float32)     # fp32 accum
    y = y + b_ref[...].astype(jnp.float32)
    if activation == "gelu":
        y = _gelu_exact(y)          # fused epilogue: no HBM trip for d_ff act
    o_ref[...] = y.astype(o_ref.dtype)


def linear_pallas(x2, w, b, *, activation=None):
    """y = act(x2 @ w + b) with x2:(M,K) fp32, w:(K,N), b:(N,)."""
    M, K = x2.shape
    N = w.shape[1]
    tm = _pick_tile_rows(M, K + N)
    grid = (pl.cdiv(M, tm),)        # ragged last block is masked by Pallas
    return pl.pallas_call(
        functools.partial(_linear_kernel, activation=activation),
        out_shape=jax.ShapeDtypeStruct((M, N), x2.dtype),
        grid_spec=pltpu.PrefetchScalarGridSpec(
            num_scalar_prefetch=0,
            grid=grid,
            in_specs=[
                pl.BlockSpec((tm, K), lambda i: (i, 0)),
                pl.BlockSpec((K, N), lambda i: (0, 0)),   # resident weights
                pl.BlockSpec((1, N), lambda i: (0, 0)),
            ],
            out_specs=pl.BlockSpec((tm, N), lambda i: (i, 0)),
        ),
        compiler_params=_compiler_params(),
    )(x2, w.astype(jnp.bfloat16), b.reshape(1, N))


# ---------------------------------------------------------------------------
# Fused linear + residual-add + LayerNorm kernel.
# Matches the PyTorch LayerNormalization: torch.std is unbiased (divide by
# d-1) and eps is added to std, not variance.
# ---------------------------------------------------------------------------
def _linear_res_ln_kernel(x_ref, w_ref, b_ref, r_ref, gamma_ref, beta_ref,
                          o_ref, *, eps):
    x = x_ref[...].astype(jnp.bfloat16)
    w = w_ref[...]                                            # bf16
    y = jnp.dot(x, w, preferred_element_type=jnp.float32)     # fp32 accum
    y = y + b_ref[...].astype(jnp.float32)
    y = y + r_ref[...].astype(jnp.float32)                    # fused residual
    d = y.shape[-1]
    mean = jnp.mean(y, axis=-1, keepdims=True)
    diff = y - mean
    var = jnp.sum(diff * diff, axis=-1, keepdims=True) * (1.0 / (d - 1))
    inv = pl.reciprocal(jnp.sqrt(var) + eps, approx=True)     # EUP slot
    gamma = gamma_ref[...].astype(jnp.float32)
    beta = beta_ref[...].astype(jnp.float32)
    o_ref[...] = (diff * (gamma * inv) + beta).astype(o_ref.dtype)


def linear_residual_ln_pallas(x2, w, b, residual, gamma, beta, *, eps=1e-5):
    """LayerNorm(residual + x2 @ w + b) over the last axis."""
    M, K = x2.shape
    N = w.shape[1]
    tm = _pick_tile_rows(M, K + 2 * N)
    grid = (pl.cdiv(M, tm),)
    return pl.pallas_call(
        functools.partial(_linear_res_ln_kernel, eps=eps),
        out_shape=jax.ShapeDtypeStruct((M, N), x2.dtype),
        grid_spec=pltpu.PrefetchScalarGridSpec(
            num_scalar_prefetch=0,
            grid=grid,
            in_specs=[
                pl.BlockSpec((tm, K), lambda i: (i, 0)),
                pl.BlockSpec((K, N), lambda i: (0, 0)),
                pl.BlockSpec((1, N), lambda i: (0, 0)),
                pl.BlockSpec((tm, N), lambda i: (i, 0)),
                pl.BlockSpec((1, N), lambda i: (0, 0)),
                pl.BlockSpec((1, N), lambda i: (0, 0)),
            ],
            out_specs=pl.BlockSpec((tm, N), lambda i: (i, 0)),
        ),
        compiler_params=_compiler_params(),
    )(x2, w.astype(jnp.bfloat16), b.reshape(1, N),
      residual, gamma.reshape(1, N), beta.reshape(1, N))


# ---------------------------------------------------------------------------
# Attention kernel: one batch element per grid step.  Heads are sliced out of
# the (S, 3*D) qkv slab in-kernel (static unroll), so no XLA-side head
# split/merge transposes; output is written straight into (B, S, H*d_k).
# ---------------------------------------------------------------------------
def _attention_kernel(qkv_ref, o_ref, *, num_heads, scale):
    qkv = qkv_ref[...].astype(jnp.float32)        # (S, 3*D)
    d3 = qkv.shape[-1]
    d_model = d3 // 3
    d_k = d_model // num_heads
    outs = []
    for h in range(num_heads):                    # static unroll over heads
        q = (qkv[:, h * d_k:(h + 1) * d_k] * scale).astype(jnp.bfloat16)
        k = qkv[:, d_model + h * d_k:
                   d_model + (h + 1) * d_k].astype(jnp.bfloat16)
        v = qkv[:, 2 * d_model + h * d_k:
                   2 * d_model + (h + 1) * d_k].astype(jnp.bfloat16)
        # Contract last dims directly (no materialized k transpose).
        s = lax.dot_general(q, k, (((1,), (1,)), ((), ())),
                            preferred_element_type=jnp.float32)   # (S, S)
        m = jnp.max(s, axis=-1, keepdims=True)
        p = jnp.exp(s - m)
        l = jnp.sum(p, axis=-1, keepdims=True)
        p = p * pl.reciprocal(l, approx=True)     # divide -> EUP slot
        outs.append(jnp.dot(p.astype(jnp.bfloat16), v,
                            preferred_element_type=jnp.float32))
    o_ref[...] = jnp.concatenate(outs, axis=-1).astype(o_ref.dtype)


def attention_pallas(qkv, num_heads):
    """qkv: (B, S, 3*D) in [q | k | v] layout -> (B, S, D) attention output."""
    B, S, D3 = qkv.shape
    D = D3 // 3
    d_k = D // num_heads
    # TODO(synk): optional attention mask not implemented (demo passes None).
    # TODO(synk): full SxS softmax per batch slab; switch to a flash-style
    # KV-tiled online softmax for long sequences (v7x 64 MiB VMEM).
    return pl.pallas_call(
        functools.partial(_attention_kernel, num_heads=num_heads,
                          scale=1.0 / math.sqrt(d_k)),
        out_shape=jax.ShapeDtypeStruct((B, S, D), qkv.dtype),
        grid_spec=pltpu.PrefetchScalarGridSpec(
            num_scalar_prefetch=0,
            grid=(B,),
            in_specs=[pl.BlockSpec((None, S, D3), lambda b: (b, 0, 0))],
            out_specs=pl.BlockSpec((None, S, D), lambda b: (b, 0, 0)),
        ),
        compiler_params=_compiler_params(),
    )(qkv)


# ---------------------------------------------------------------------------
# Encoder forward assembled from the Pallas kernels.
# ---------------------------------------------------------------------------
def encoder_layer_pallas(x, p, num_heads, eps=1e-5):
    B, S, D = x.shape
    x2 = x.reshape(B * S, D)
    # TODO(synk): nn.Dropout treated as identity (inference / eval mode).
    qkv = linear_pallas(x2, p["wqkv"], p["bqkv"]).reshape(B, S, 3 * D)
    attn = attention_pallas(qkv, num_heads).reshape(B * S, D)
    # out_proj + residual + norm1 fused into one kernel.
    x1 = linear_residual_ln_pallas(attn, p["wo"], p["bo"], x2,
                                   p["gamma1"], p["beta1"], eps=eps)
    # FFN-1 with the exact-GELU epilogue fused.
    h = linear_pallas(x1, p["w1"], p["b1"], activation="gelu")
    # FFN-2 + residual + norm2 fused.
    out = linear_residual_ln_pallas(h, p["w2"], p["b2"], x1,
                                    p["gamma2"], p["beta2"], eps=eps)
    return out.reshape(B, S, D)


def encoder_pallas(x, params, num_heads, mask=None, eps=1e-5):
    assert mask is None  # TODO(synk): mask path not implemented.
    for p in params:
        x = encoder_layer_pallas(x, p, num_heads, eps=eps)
    return x


# ---------------------------------------------------------------------------
# Parameter init mirroring the PyTorch module's __init__ (xavier_uniform
# weights, zero biases, gamma=1, beta=0).  Weights stored as (in, out).
# ---------------------------------------------------------------------------
def _xavier_t(key, out_features, in_features):
    a = math.sqrt(6.0 / (in_features + out_features))
    w = jax.random.uniform(key, (out_features, in_features),
                           minval=-a, maxval=a, dtype=jnp.float32)
    return w.T


def init_layer_params(key, d_model, d_ff):
    k = jax.random.split(key, 4)
    return dict(
        wqkv=_xavier_t(k[0], 3 * d_model, d_model),
        bqkv=jnp.zeros((3 * d_model,), jnp.float32),
        wo=_xavier_t(k[1], d_model, d_model),
        bo=jnp.zeros((d_model,), jnp.float32),
        w1=_xavier_t(k[2], d_ff, d_model),
        b1=jnp.zeros((d_ff,), jnp.float32),
        w2=_xavier_t(k[3], d_model, d_ff),
        b2=jnp.zeros((d_model,), jnp.float32),
        gamma1=jnp.ones((d_model,), jnp.float32),
        beta1=jnp.zeros((d_model,), jnp.float32),
        gamma2=jnp.ones((d_model,), jnp.float32),
        beta2=jnp.zeros((d_model,), jnp.float32),
    )


# ---------------------------------------------------------------------------
# Pure-JAX reference of the PyTorch forward (for the in-script sanity check).
# ---------------------------------------------------------------------------
def _layer_norm_ref(x, gamma, beta, eps):
    mean = jnp.mean(x, axis=-1, keepdims=True)
    d = x.shape[-1]
    var = jnp.sum((x - mean) ** 2, axis=-1, keepdims=True) / (d - 1)
    std = jnp.sqrt(var)
    return gamma * (x - mean) / (std + eps) + beta


def _encoder_ref(x, params, num_heads, eps=1e-5):
    for p in params:
        B, S, D = x.shape
        d_k = D // num_heads
        qkv = x @ p["wqkv"] + p["bqkv"]
        q, k, v = jnp.split(qkv, 3, axis=-1)

        def sh(t):
            return t.reshape(B, S, num_heads, d_k).transpose(0, 2, 1, 3)

        qh, kh, vh = sh(q), sh(k), sh(v)
        s = jnp.einsum("bhqd,bhkd->bhqk", qh, kh) / math.sqrt(d_k)
        a = jax.nn.softmax(s, axis=-1)
        o = jnp.einsum("bhqk,bhkd->bhqd", a, vh)
        o = o.transpose(0, 2, 1, 3).reshape(B, S, D)
        attn = o @ p["wo"] + p["bo"]
        x = _layer_norm_ref(x + attn, p["gamma1"], p["beta1"], eps)
        h = jax.nn.gelu(x @ p["w1"] + p["b1"], approximate=False)
        ffn = h @ p["w2"] + p["b2"]
        x = _layer_norm_ref(x + ffn, p["gamma2"], p["beta2"], eps)
    return x


if __name__ == "__main__":
    # Small but lane-dense demo: d_model=128 keeps the last dim a full vreg
    # lane width; everything else stays tiny.
    batch, seq, d_model, num_heads, d_ff, num_layers = 2, 8, 128, 4, 256, 2

    key = jax.random.PRNGKey(0)
    kx, *klayers = jax.random.split(key, num_layers + 1)
    x = jax.random.normal(kx, (batch, seq, d_model), dtype=jnp.float32)
    params = [init_layer_params(k, d_model, d_ff) for k in klayers]

    out = encoder_pallas(x, params, num_heads, mask=None)
    out = jax.block_until_ready(out)

    with jax.default_matmul_precision("highest"):
        ref = _encoder_ref(x, params, num_heads)
    ref = jax.block_until_ready(ref)

    assert out.shape == x.shape
    assert bool(jnp.all(jnp.isfinite(out)))
    # Tolerance accommodates bf16 MXU operands (fp32 accumulation), the EUP
    # approx reciprocals, and the polynomial erf vs. the fp32 XLA reference.
    assert jnp.allclose(out, ref, atol=3e-2, rtol=3e-2)
    print("KERNEL_OK")
</pallas_src>

<mosaic_0001>
module attributes {stable_mosaic.version = 11 : i64} {
  func.func @_linear_kernel(%arg0: i32, %arg1: memref<16x128xf32, #tpu.memory_space<vmem>>, %arg2: memref<128x384xbf16, #tpu.memory_space<vmem>>, %arg3: memref<1x384xf32, #tpu.memory_space<vmem>>, %arg4: memref<16x384xf32, #tpu.memory_space<vmem>>) attributes {dimension_semantics = [#tpu.dimension_semantics<parallel>], iteration_bounds = array<i64: 1>, scalar_prefetch = 0 : i64, scratch_operands = 0 : i64, tpu.core_type = #tpu.core_type<tc>, window_params = [{transform_indices = @transform_0, window_bounds = array<i64: 16, 128>}, {pipeline_mode = #tpu.pipeline_mode<synchronous>, transform_indices = @transform_1, window_bounds = array<i64: 128, 384>}, {pipeline_mode = #tpu.pipeline_mode<synchronous>, transform_indices = @transform_2, window_bounds = array<i64: 1, 384>}, {transform_indices = @transform_3, window_bounds = array<i64: 16, 384>}]} {
    %c0 = arith.constant 0 : index
    %c0_0 = arith.constant 0 : index
    %0 = vector.load %arg1[%c0, %c0_0] : memref<16x128xf32, #tpu.memory_space<vmem>>, vector<16x128xf32>
    %1 = arith.truncf %0 : vector<16x128xf32> to vector<16x128xbf16>
    %c0_1 = arith.constant 0 : index
    %c0_2 = arith.constant 0 : index
    %2 = vector.load %arg2[%c0_1, %c0_2] : memref<128x384xbf16, #tpu.memory_space<vmem>>, vector<128x384xbf16>
    %cst = arith.constant dense<0.000000e+00> : vector<16x384xf32>
    %3 = tpu.matmul %1, %2, %cst {dimension_numbers = #tpu.dot_dimension_numbers<[1], [0], [0], [1], [0, 0, 1, 1], [], []>} : vector<16x128xbf16>, vector<128x384xbf16>, vector<16x384xf32> -> vector<16x384xf32>
    %c0_3 = arith.constant 0 : index
    %c0_4 = arith.constant 0 : index
    %4 = vector.load %arg3[%c0_3, %c0_4] : memref<1x384xf32, #tpu.memory_space<vmem>>, vector<1x384xf32>
    %5 = vector.broadcast %4 : vector<1x384xf32> to vector<16x384xf32>
    %6 = arith.addf %3, %5 : vector<16x384xf32>
    %c0_5 = arith.constant 0 : index
    %c0_6 = arith.constant 0 : index
    %7 = vector.load %arg4[%c0_5, %c0_6] : memref<16x384xf32, #tpu.memory_space<vmem>>, vector<16x384xf32>
    tpu.vector_store %arg4[%c0_5, %c0_6], %6 {strides = array<i32>} : memref<16x384xf32, #tpu.memory_space<vmem>>, vector<16x384xf32>,
    return
  }
  func.func @transform_0(%arg0: i32) -> (i32, i32) {
    %c0_i32 = arith.constant 0 : i32
    %c0_i32_0 = arith.constant 0 : i32
    return %arg0, %c0_i32 : i32, i32
  }
  func.func @transform_1(%arg0: i32) -> (i32, i32) {
    %c0_i32 = arith.constant 0 : i32
    %c0_i32_0 = arith.constant 0 : i32
    %c0_i32_1 = arith.constant 0 : i32
    return %c0_i32, %c0_i32_0 : i32, i32
  }
  func.func @transform_2(%arg0: i32) -> (i32, i32) {
    %c0_i32 = arith.constant 0 : i32
    %c0_i32_0 = arith.constant 0 : i32
    %c0_i32_1 = arith.constant 0 : i32
    return %c0_i32, %c0_i32_0 : i32, i32
  }
  func.func @transform_3(%arg0: i32) -> (i32, i32) {
    %c0_i32 = arith.constant 0 : i32
    %c0_i32_0 = arith.constant 0 : i32
    return %arg0, %c0_i32 : i32, i32
  }
}

</mosaic_0001>

<bundles_post_ra>
// kernel: tpu_custom_call.1
= control target key start
LH: loop header
LB: loop body
LE: loop exit
PB: predicated region body
PF: predicated region fallthrough
CT: control target
= control target key end

     0   :  { %8 = vsyncpa [#allocation3], 0  ;;  %s572_s0 = inlined_call_operand.hbm [shape: f32[16,128], index: 0, kind: input, shape index: {}]   ;;  %s573_s1 = inlined_call_operand.hbm [shape: bf16[128,384], index: 1, kind: input, shape index: {}]   ;;  %s574_s2 = inlined_call_operand.vmem [shape: f32[1,384], index: 2, kind: input, shape index: {}]   ;;  %s575_s3 = inlined_call_operand.hbm [shape: f32[16,384], index: 3, kind: output, shape index: {}]  }
   0x1   :  { %9 = vsyncpa [#allocation6], 0 }
   0x2   :  { %10 = vsyncpa [#allocation4], 0  ;;  %s501_s12 = smov [#allocation2]   ;;  %s429_s16 = scalar_lea.hbm %s572_s0, 256 }
   0x3   :  { %s16_s13 = sshll.u32 %s501_s12, 4  ;;  %p430_p0 = scmp.ne.s32.totalorder %s572_s0, %s429_s16  ;;  %s17_s13 = int_to_ptr.vmem [resolvable:$true] %s16_s13 }
   0x4   :  { %p433_p1 = scmp.lt.u32.totalorder %s429_s16, %s572_s0 }
   0x6   :  { %p435_p2 = pnand %p433_p1, %p430_p0 }
   0x8   :  { %438 = shalt.err (!%p435_p2)
}
   0x9   :  { %s439_s21 = scalar_lea.vmem %s17_s13, 256  ;;  %p444_p4 = scmp.lt.s32.totalorder %s17_s13, %s17_s13 }
   0xa   :  { %p440_p3 = scmp.ne.s32.totalorder %s17_s13, %s439_s21  ;;  %p445_p5 = scmp.lt.s32.totalorder %s439_s21, %s439_s21 }
   0xc   :  { %p446_p6 = por %p445_p5, %p444_p4 }
   0xe   :  { %p447_p7 = pnand %p446_p6, %p440_p3 }
  0x10   :  { %450 = shalt.err (!%p447_p7)
}
  0x11   :  { %s502_s22 = smov 128   ;;  %s503_s23 = smov 8  }
  0x12   :  { %22 = dma.hbm_to_vmem [thread:$0]  %s572_s0, 256, %s17_s13, [#allocation3], %s502_s22, %s502_s22, %s503_s23  }
  0x13   :  { %s504_s26 = smov [#allocation5]   ;;  %s451_s30 = scalar_lea.hbm %s573_s1, 3072 }
  0x14   :  { %s28_s27 = sshll.u32 %s504_s26, 4  ;;  %p452_p8 = scmp.ne.s32.totalorder %s573_s1, %s451_s30  ;;  %s29_s27 = int_to_ptr.vmem [resolvable:$true] %s28_s27 }
  0x15   :  { %p455_p9 = scmp.lt.u32.totalorder %s451_s30, %s573_s1 }
  0x17   :  { %p457_p10 = pnand %p455_p9, %p452_p8 }
  0x19   :  { %460 = shalt.err (!%p457_p10)
}
  0x1a   :  { %s461_s8 = scalar_lea.vmem %s29_s27, 3072  ;;  %p466_p12 = scmp.lt.s32.totalorder %s29_s27, %s29_s27 }
  0x1b   :  { %p462_p11 = scmp.ne.s32.totalorder %s29_s27, %s461_s8  ;;  %p467_p13 = scmp.lt.s32.totalorder %s461_s8, %s461_s8 }
  0x1d   :  { %p468_p0 = por %p467_p13, %p466_p12 }
  0x1f   :  { %p469_p1 = pnand %p468_p0, %p462_p11 }
  0x21   :  { %472 = shalt.err (!%p469_p1)
}
  0x22   :  { %s505_s0 = smov 192   ;;  %s506_s9 = smov 12  }
  0x23   :  { %34 = dma.hbm_to_vmem [thread:$0]  %s573_s1, 3072, %s29_s27, [#allocation6], %s505_s0, %s505_s0, %s506_s9  }
  0x24   :  { %495 = dma.done.wait [#allocation3], 256  }
  0x25   :  { %496 = vsyncadd [#allocation3], 4294967040 }
  0x26   :  { %497 = dma.done.wait [#allocation6], 3072  }
  0x27   :  { %498 = vsyncadd [#allocation6], 4294964224  ;;  %v507_v0 = vmov 0.0   ;;  %vm508_vm0 = vmmov 0   ;;  %v509_v1 = vmov 0   ;;  %v44_v25 = vld [vmem:[#allocation2] sm:$0xff]  ;;  %v81_v29 = vlaneseq }
  0x28   :  { %365 = vmatprep.subr.bf16.mxu1 %v507_v0  ;;  %381 = vmatprep.mubr.msk.bf16.mxu1 %vm508_vm0, %v507_v0  ;;  %v397_v2 = vld [vmem:[#allocation5 + $0x4] ss:$12 sps:$4 sm:$0xff]   ;;  %v399_v3 = vld [vmem:[#allocation5 + $0x8] ss:$12 sps:$4 sm:$0xff]   ;;  %v400_v4 = vld [vmem:[#allocation5] ss:$12 sps:$4 sm:$0xff]  }
  0x29   :  { %256 = vmatprep.mubr.bf16.mxu0 %v509_v1  ;;  %224 = vmatprep.subr.bf16.mxu0 %v397_v2  ;;  %v401_v5 = vld [vmem:[#allocation5 + $0x1c] ss:$12 sps:$4 sm:$0xff]   ;;  %v403_v6 = vld [vmem:[#allocation5 + $0x20] ss:$12 sps:$4 sm:$0xff]   ;;  %v404_v7 = vld [vmem:[#allocation5 + $0x18] ss:$12 sps:$4 sm:$0xff]  }
  0x2a   :  { %366 = vmatpush3.bf16.msra.mxu1 %v399_v3  ;;  %225 = vmatpush1.bf16.msra.mxu0 %v400_v4  ;;  %v405_v8 = vld [vmem:[#allocation5 + $0x34] ss:$12 sps:$4 sm:$0xff]   ;;  %v407_v9 = vld [vmem:[#allocation5 + $0x38] ss:$12 sps:$4 sm:$0xff]   ;;  %v408_v10 = vld [vmem:[#allocation5 + $0x30] ss:$12 sps:$4 sm:$0xff]  }
  0x2b   :  { %367 = vmatprep.subr.bf16.mxu1 %v507_v0  ;;  %226 = vmatprep.subr.bf16.mxu0 %v401_v5  ;;  %v409_v11 = vld [vmem:[#allocation5 + $0x4c] ss:$12 sps:$4 sm:$0xff]   ;;  %v411_v12 = vld [vmem:[#allocation5 + $0x50] ss:$12 sps:$4 sm:$0xff]   ;;  %v412_v13 = vld [vmem:[#allocation5 + $0x48] ss:$12 sps:$4 sm:$0xff]  }
  0x2c   :  { %v413_v14 = vld [vmem:[#allocation5 + $0x64] ss:$12 sps:$4 sm:$0xff]   ;;  %v415_v15 = vld [vmem:[#allocation5 + $0x68] ss:$12 sps:$4 sm:$0xff]   ;;  %v416_v16 = vld [vmem:[#allocation5 + $0x60] ss:$12 sps:$4 sm:$0xff]  }
  0x2d   :  { %v417_v17 = vld [vmem:[#allocation5 + $0x7c] ss:$12 sps:$4 sm:$0xff]   ;;  %v419_v18 = vld [vmem:[#allocation5 + $0x80] ss:$12 sps:$4 sm:$0xff]   ;;  %v420_v19 = vld [vmem:[#allocation5 + $0x78] ss:$12 sps:$4 sm:$0xff]  }
  0x2e   :  { %368 = vmatpush3.bf16.msra.mxu1 %v403_v6  ;;  %227 = vmatpush1.bf16.msra.mxu0 %v404_v7  ;;  %v421_v20 = vld [vmem:[#allocation5 + $0x94] ss:$12 sps:$4 sm:$0xff]   ;;  %v423_v21 = vld [vmem:[#allocation5 + $0x98] ss:$12 sps:$4 sm:$0xff]   ;;  %v424_v22 = vld [vmem:[#allocation5 + $0x90] ss:$12 sps:$4 sm:$0xff]  }
  0x2f   :  { %369 = vmatprep.subr.bf16.mxu1 %v507_v0  ;;  %228 = vmatprep.subr.bf16.mxu0 %v405_v8  ;;  %v425_v23 = vld [vmem:[#allocation5 + $0xac] ss:$12 sps:$4 sm:$0xff]   ;;  %v427_v24 = vld [vmem:[#allocation5 + $0xb0] ss:$12 sps:$4 sm:$0xff]   ;;  %v428_v27 = vld [vmem:[#allocation5 + $0xa8] ss:$12 sps:$4 sm:$0xff]  }
  0x30   :  { %v45_v26 = vld [vmem:[#allocation2 + $0x8] sm:$0xff]  ;;  %v82_v30 = vshrl.u32 %v81_v29, 7  ;;  %v79_v32 = vld [vmem:[%s574_s2] sm:$0x7]  ;;  %s510_s13 = smov [#allocation7]  }
  0x31   :  { %v46_v28 = vpack.c.bf16 %v45_v26, %v44_v25  ;;  %s319_s14 = sshll.u32 %s510_s13, 4  ;;  %s320_s14 = int_to_ptr.vmem [resolvable:$true] %s319_s14 }
  0x32   :  { %370 = vmatpush3.bf16.msra.mxu1 %v407_v9  ;;  %229 = vmatpush1.bf16.msra.mxu0 %v408_v10  ;;  %v91_v31 = vsub.s32 2, %v82_v30  ;;  %v83_v33 = vsub.s32 0, %v82_v30  ;;  %v87_v34 = vsub.s32 1, %v82_v30  ;;  %s473_s2 = scalar_lea.vmem %s320_s14, 768  ;;  %p478_p3 = scmp.lt.s32.totalorder %s320_s14, %s320_s14 }
  0x33   :  { %371 = vmatprep.subr.bf16.mxu1 %v507_v0  ;;  %230 = vmatprep.subr.bf16.mxu0 %v409_v11  ;;  %p474_p2 = scmp.ne.s32.totalorder %s320_s14, %s473_s2  ;;  %p479_p4 = scmp.lt.s32.totalorder %s473_s2, %s473_s2 }
  0x34   :  { %v92_v35 = vrot.slane %v79_v32, %v91_v31  ;;  %v84_v36 = vrot.slane %v79_v32, %v83_v33  ;;  %v88_v37 = vrot.slane %v79_v32, %v87_v34 }
  0x35   :  { %p480_p5 = por %p479_p4, %p478_p3 }
  0x36   :  { %372 = vmatpush3.bf16.msra.mxu1 %v411_v12  ;;  %231 = vmatpush1.bf16.msra.mxu0 %v412_v13 }
  0x37   :  { %373 = vmatprep.subr.bf16.mxu1 %v507_v0  ;;  %232 = vmatprep.subr.bf16.mxu0 %v413_v14  ;;  %p481_p6 = pnand %p480_p5, %p474_p2 }
  0x3a   :  { %374 = vmatpush3.bf16.msra.mxu1 %v415_v15  ;;  %233 = vmatpush1.bf16.msra.mxu0 %v416_v16 }
  0x3b   :  { %375 = vmatprep.subr.bf16.mxu1 %v507_v0  ;;  %234 = vmatprep.subr.bf16.mxu0 %v417_v17 }
  0x3e   :  { %376 = vmatpush3.bf16.msra.mxu1 %v419_v18  ;;  %235 = vmatpush1.bf16.msra.mxu0 %v420_v19 }
  0x3f   :  { %377 = vmatprep.subr.bf16.mxu1 %v507_v0  ;;  %236 = vmatprep.subr.bf16.mxu0 %v421_v20 }
  0x42   :  { %378 = vmatpush3.bf16.msra.mxu1 %v423_v21  ;;  %237 = vmatpush1.bf16.msra.mxu0 %v424_v22 }
  0x43   :  { %379 = vmatprep.subr.bf16.mxu1 %v507_v0  ;;  %238 = vmatprep.subr.bf16.mxu0 %v425_v23 }
  0x46   :  { %380 = vmatpush3.bf16.msra.mxu1 %v427_v24  ;;  %239 = vmatpush1.bf16.msra.mxu0 %v428_v27 }
  0x49   :  { %382 = vmatmul.mubr.bf16.vlgmr.msra.gmra.mrb[0].mxu1 %v46_v28  ;;  %257 = vmatmul.mubr.bf16.vlgmr.msra.gmra.mrb[0].mxu0 %v46_v28 }
 0x11c   :  { %v301_v38 = vpop.f32.mrb[0].mxu1  ;;  %v258_v40 = vpop.f32.mrb[0].mxu0 }
 0x11d   :  { %v302_v39 = vadd.f32 %v301_v38, %v92_v35  ;;  %v383_v41 = vpop.f32.mrb[1].mxu1  ;;  %v259_v42 = vadd.f32 %v258_v40, %v84_v36  ;;  %v260_v43 = vpop.f32.mrb[1].mxu0 }
 0x11e   :  { %v304_v44 = vpop.f32.mrb[2].mxu1  ;;  %v261_v45 = vadd.f32 %v260_v43, %v88_v37  ;;  %v262_v47 = vpop.f32.mrb[2].mxu0 }
 0x11f   :  { %310 = vst [vmem:[#allocation7 + $0x10] sm:$0xff] %v302_v39  ;;  %v305_v46 = vadd.f32 %v304_v44, %v92_v35  ;;  %v384_v48 = vpop.f32.mrb[3].mxu1  ;;  %308 = vst [vmem:[#allocation7] sm:$0xff] %v259_v42  ;;  %v263_v49 = vadd.f32 %v262_v47, %v84_v36  ;;  %v264_v50 = vpop.f32.mrb[3].mxu0 }
 0x120   :  { %309 = vst [vmem:[#allocation7 + $0x8] sm:$0xff] %v261_v45  ;;  %v265_v51 = vadd.f32 %v264_v50, %v88_v37 }
 0x121   :  { %313 = vst [vmem:[#allocation7 + $0x28] sm:$0xff] %v305_v46  ;;  %311 = vst [vmem:[#allocation7 + $0x18] sm:$0xff] %v263_v49 }
 0x122   :  { %312 = vst [vmem:[#allocation7 + $0x20] sm:$0xff] %v265_v51 }
 0x123   :  { %484 = shalt.err (!%p481_p6)
}
 0x124   :  { %s485_s17 = scalar_lea.hbm %s575_s3, 768 }
 0x125   :  { %p486_p7 = scmp.ne.s32.totalorder %s575_s3, %s485_s17  ;;  %p489_p8 = scmp.lt.u32.totalorder %s485_s17, %s575_s3 }
 0x127   :  { %p491_p9 = pnand %p489_p8, %p486_p7 }
 0x129   :  { %494 = shalt.err (!%p491_p9)
}
 0x12a   :  { %s511_s22 = smov 384   ;;  %s512_s23 = smov 24  }
 0x12b   :  { %325 = dma.vmem_to_hbm [thread:$0]  %s320_s14, 768, %s575_s3, [#allocation4], %s511_s22, %s511_s22, %s512_s23  }
 0x12c   :  { %499 = dma.done.wait [#allocation4], 768  }
 0x12d   :  { %500 = vsyncadd [#allocation4], 4294966528 }
 0x12e   :  { %329 = vsyncpa [#allocation3], 1 }
 0x12f   :  { %330 = vsyncpa [#allocation6], 1 }
 0x130   :  { %331 = vsyncpa [#allocation4], 1 }

</bundles_post_ra>
